<compile_context>
chip_gen: v7x
topology: tpu7x:2x2x1
jax: 0.10.0
libtpu: 0.0.40
codegen_flags: <defaults>
</compile_context>

<pallas_src>
import functools

import jax
import jax.numpy as jnp
from jax.experimental import pallas as pl
from jax.experimental.pallas import tpu as pltpu


# -----------------------------------------------------------------------------------
# Pallas kernel: streaming single-pass (shifted) variance of an (N, M) matrix.
# -----------------------------------------------------------------------------------
def _variance_kernel(shift_ref, x_ref, var_ref, s_ref, ss_ref, *, nrows, row_block):
    """Grid axis 0 walks row slabs of the similarity matrix (sequential reduction).

    shift_ref : (1, 1) f32 in SMEM  -- numerical shift (variance is shift-invariant).
    x_ref     : (row_block, M) slab of the similarity matrix in VMEM.
    var_ref   : (1, 1) f32 output (unbiased variance), written on the last grid step.
    s_ref/ss_ref : (1, 1) f32 VMEM scratch accumulators (running sum / sum of squares).
    """
    i = pl.program_id(0)

    @pl.when(i == 0)
    def _init():
        s_ref[...] = jnp.zeros_like(s_ref)
        ss_ref[...] = jnp.zeros_like(ss_ref)

    x = x_ref[...].astype(jnp.float32)           # (row_block, M), f32 accumulation
    d = x - shift_ref[0, 0]                      # shifted values

    # Mask padded rows of a ragged last slab (static check: zero cost when divisible).
    if nrows % row_block != 0:
        row_ids = jax.lax.broadcasted_iota(jnp.int32, x.shape, 0)
        valid = (i * row_block + row_ids) < nrows
        d = jnp.where(valid, d, 0.0)

    s_ref[...] += jnp.sum(d, keepdims=True)
    ss_ref[...] += jnp.sum(d * d, keepdims=True)

    @pl.when(i == pl.num_programs(0) - 1)
    def _finalize():
        n = nrows * x_ref.shape[1]               # logical (unpadded) element count
        s = s_ref[...]
        ss = ss_ref[...]
        var_ref[...] = (ss - (s * s) / n) / (n - 1)   # torch.var() default: ddof=1


def _pick_row_block(nrows, ncols, itemsize, target_bytes=4 * 1024 * 1024):
    """Biggest row slab that keeps a double-buffered block ~<= 8 MiB (safe on v7x 64 MiB)."""
    tm = max(8, target_bytes // max(1, ncols * itemsize))
    tm = int(min(tm, nrows))
    if tm < nrows:
        tm = max(8, (tm // 8) * 8)
    return tm


def variance_pallas(sim_matrix, row_block=None):
    """Unbiased variance of all elements of sim_matrix via a tiled Pallas reduction."""
    nrows, ncols = sim_matrix.shape
    itemsize = jnp.dtype(sim_matrix.dtype).itemsize
    if row_block is None:
        row_block = _pick_row_block(nrows, ncols, itemsize)
    row_block = int(min(row_block, nrows))
    if row_block < nrows:
        row_block = max(8, (row_block // 8) * 8)
    grid_m = pl.cdiv(nrows, row_block)

    # Scalar shift: variance is invariant to it, so any cheap value works.
    shift = sim_matrix[0, 0].astype(jnp.float32).reshape(1, 1)

    block_bytes = row_block * ncols * itemsize
    vmem_limit = int(min(64 * 1024 * 1024, max(32 * 1024 * 1024, 4 * block_bytes)))

    kernel = functools.partial(_variance_kernel, nrows=nrows, row_block=row_block)

    var = pl.pallas_call(
        kernel,
        out_shape=jax.ShapeDtypeStruct((1, 1), jnp.float32),
        grid=(grid_m,),
        in_specs=[
            pl.BlockSpec(memory_space=pltpu.MemorySpace.SMEM),       # shift scalar (1, 1)
            pl.BlockSpec((row_block, ncols), lambda i: (i, 0)),      # row slab, full width
        ],
        out_specs=pl.BlockSpec((1, 1), lambda i: (0, 0)),
        scratch_shapes=[
            pltpu.VMEM((1, 1), jnp.float32),                         # running sum
            pltpu.VMEM((1, 1), jnp.float32),                         # running sum of squares
        ],
        compiler_params=pltpu.CompilerParams(
            dimension_semantics=("arbitrary",),                      # sequential reduction axis
            vmem_limit_bytes=vmem_limit,
        ),
        # NOTE: on v7x the row-slab axis could be split across the 2 TensorCores with
        # per-core partial (sum, sumsq) outputs for ~2x effective HBM bandwidth.
    )(shift, sim_matrix)
    return var[0, 0]


# -----------------------------------------------------------------------------------
# Scalar epilogue (tiny 2-layer MLP + exp) in plain JAX — XLA fuses it.
# -----------------------------------------------------------------------------------
def mlp_temperature(variance, params):
    w1, b1, w2, b2 = params
    h = jnp.maximum(variance * w1 + b1, 0.0)     # Linear(1, H) + ReLU
    log_temp = jnp.dot(h, w2) + b2               # Linear(H, 1)
    return jnp.exp(log_temp)                     # temperature > 0


def dynamic_temperature(sim_matrix, params, *, row_block=None, use_pallas=None):
    """Forward pass of DynamicTemperature: temperature = exp(MLP(var(sim_matrix)))."""
    if use_pallas is None:
        # Tiny matrices: pallas_call would be pure launch/DMA-setup overhead.
        use_pallas = sim_matrix.size >= 128 * 128
    if use_pallas:
        variance = variance_pallas(sim_matrix, row_block=row_block)
    else:
        variance = jnp.var(sim_matrix.astype(jnp.float32), ddof=1)
    return mlp_temperature(variance, params)


# -----------------------------------------------------------------------------------
# Params / reference
# -----------------------------------------------------------------------------------
def init_params(key, hidden_dim=16):
    """PyTorch nn.Linear default init: U[-1/sqrt(fan_in), 1/sqrt(fan_in)]."""
    k1, k2, k3, k4 = jax.random.split(key, 4)
    w1 = jax.random.uniform(k1, (hidden_dim,), jnp.float32, -1.0, 1.0)   # Linear(1, H), fan_in=1
    b1 = jax.random.uniform(k2, (hidden_dim,), jnp.float32, -1.0, 1.0)
    bound = 1.0 / (hidden_dim ** 0.5)                                    # Linear(H, 1), fan_in=H
    w2 = jax.random.uniform(k3, (hidden_dim,), jnp.float32, -bound, bound)
    b2 = jax.random.uniform(k4, (), jnp.float32, -bound, bound)
    return w1, b1, w2, b2


def reference(sim_matrix, params):
    """Pure-JAX reference mirroring the PyTorch forward."""
    x = sim_matrix.astype(jnp.float32)
    var = jnp.var(x, ddof=1)                     # torch.var() default (unbiased)
    return mlp_temperature(var, params)


if __name__ == "__main__":
    key = jax.random.PRNGKey(0)
    k_sim, k_ragged, k_small, k_params = jax.random.split(key, 4)
    params = init_params(k_params, hidden_dim=16)

    # 1) Moderate similarity matrix -> exercises the tiled Pallas reduction
    #    (row_block=64 -> 4 pipelined grid steps).
    sim = jax.random.normal(k_sim, (256, 256), jnp.float32)
    temp = dynamic_temperature(sim, params, row_block=64, use_pallas=True)
    temp = jax.block_until_ready(temp)
    ref = reference(sim, params)
    assert jnp.allclose(temp, ref, rtol=1e-4, atol=1e-6), (temp, ref)

    # 2) Ragged row count (200 not divisible by 64) -> exercises the row-mask path.
    sim_r = jax.random.normal(k_ragged, (200, 256), jnp.float32)
    temp_r = dynamic_temperature(sim_r, params, row_block=64, use_pallas=True)
    temp_r = jax.block_until_ready(temp_r)
    ref_r = reference(sim_r, params)
    assert jnp.allclose(temp_r, ref_r, rtol=1e-4, atol=1e-6), (temp_r, ref_r)

    # 3) The module's typical tiny N=8 batch -> wrapper auto-selects the fused JAX path.
    sim_s = jax.random.normal(k_small, (8, 8), jnp.float32)
    temp_s = jax.block_until_ready(dynamic_temperature(sim_s, params))
    ref_s = reference(sim_s, params)
    assert jnp.allclose(temp_s, ref_s, rtol=1e-4, atol=1e-6), (temp_s, ref_s)

    print("KERNEL_OK")
</pallas_src>

<mosaic_0001>
module attributes {stable_mosaic.version = 11 : i64} {
  func.func @_variance_kernel(%arg0: i32, %arg1: memref<1x1xf32, #tpu.memory_space<smem>>, %arg2: memref<64x256xf32, #tpu.memory_space<vmem>>, %arg3: memref<1x1xf32, #tpu.memory_space<vmem>>, %arg4: memref<1x1xf32, #tpu.memory_space<vmem>>, %arg5: memref<1x1xf32, #tpu.memory_space<vmem>>) attributes {dimension_semantics = [#tpu.dimension_semantics<arbitrary>], iteration_bounds = array<i64: 4>, scalar_prefetch = 0 : i64, scratch_operands = 2 : i64, tpu.core_type = #tpu.core_type<tc>, window_params = [{transform_indices = @transform_0, window_bounds = array<i64: 1, 1>}, {transform_indices = @transform_1, window_bounds = array<i64: 64, 256>}, {pipeline_mode = #tpu.pipeline_mode<synchronous>, transform_indices = @transform_2, window_bounds = array<i64: 1, 1>}]} {
    %c0_i32 = arith.constant 0 : i32
    %0 = arith.cmpi eq, %arg0, %c0_i32 : i32
    %1 = arith.extui %0 : i1 to i32
    %c0_i32_0 = arith.constant 0 : i32
    %2 = arith.cmpi ne, %1, %c0_i32_0 : i32
    scf.if %2 {
      %cst_14 = arith.constant 0.000000e+00 : f32
      %27 = vector.broadcast %cst_14 : f32 to vector<1x1xf32>
      %c0_15 = arith.constant 0 : index
      %c0_16 = arith.constant 0 : index
      %28 = vector.load %arg4[%c0_15, %c0_16] : memref<1x1xf32, #tpu.memory_space<vmem>>, vector<1x1xf32>
      tpu.vector_store %arg4[%c0_15, %c0_16], %27 {strides = array<i32>} : memref<1x1xf32, #tpu.memory_space<vmem>>, vector<1x1xf32>,
      %cst_17 = arith.constant 0.000000e+00 : f32
      %29 = vector.broadcast %cst_17 : f32 to vector<1x1xf32>
      %c0_18 = arith.constant 0 : index
      %c0_19 = arith.constant 0 : index
      %30 = vector.load %arg5[%c0_18, %c0_19] : memref<1x1xf32, #tpu.memory_space<vmem>>, vector<1x1xf32>
      tpu.vector_store %arg5[%c0_18, %c0_19], %29 {strides = array<i32>} : memref<1x1xf32, #tpu.memory_space<vmem>>, vector<1x1xf32>,
    } else {
    }
    %c0 = arith.constant 0 : index
    %c0_1 = arith.constant 0 : index
    %3 = vector.load %arg2[%c0, %c0_1] : memref<64x256xf32, #tpu.memory_space<vmem>>, vector<64x256xf32>
    %c0_2 = arith.constant 0 : index
    %c0_3 = arith.constant 0 : index
    %4 = memref.load %arg1[%c0_2, %c0_3] : memref<1x1xf32, #tpu.memory_space<smem>>
    %5 = vector.broadcast %4 : f32 to vector<64x256xf32>
    %6 = arith.subf %3, %5 : vector<64x256xf32>
    %c0_4 = arith.constant 0 : index
    %c0_5 = arith.constant 0 : index
    %7 = vector.load %arg4[%c0_4, %c0_5] : memref<1x1xf32, #tpu.memory_space<vmem>>, vector<1x1xf32>
    %8 = vector.shape_cast %6 : vector<64x256xf32> to vector<1x64x256xf32>
    %cst = arith.constant dense<0.000000e+00> : vector<1xf32>
    %9 = vector.multi_reduction <add>, %8, %cst [1, 2] : vector<1x64x256xf32> to vector<1xf32>
    %10 = vector.shape_cast %9 : vector<1xf32> to vector<1x1x1xf32>
    %11 = vector.extract %10[0, 0, 0] : f32 from vector<1x1x1xf32>
    %12 = vector.broadcast %11 : f32 to vector<1x1xf32>
    %13 = arith.addf %7, %12 : vector<1x1xf32>
    %c0_6 = arith.constant 0 : index
    %c0_7 = arith.constant 0 : index
    %14 = vector.load %arg4[%c0_6, %c0_7] : memref<1x1xf32, #tpu.memory_space<vmem>>, vector<1x1xf32>
    tpu.vector_store %arg4[%c0_6, %c0_7], %13 {strides = array<i32>} : memref<1x1xf32, #tpu.memory_space<vmem>>, vector<1x1xf32>,
    %c0_8 = arith.constant 0 : index
    %c0_9 = arith.constant 0 : index
    %15 = vector.load %arg5[%c0_8, %c0_9] : memref<1x1xf32, #tpu.memory_space<vmem>>, vector<1x1xf32>
    %16 = arith.mulf %6, %6 : vector<64x256xf32>
    %17 = vector.shape_cast %16 : vector<64x256xf32> to vector<1x64x256xf32>
    %cst_10 = arith.constant dense<0.000000e+00> : vector<1xf32>
    %18 = vector.multi_reduction <add>, %17, %cst_10 [1, 2] : vector<1x64x256xf32> to vector<1xf32>
    %19 = vector.shape_cast %18 : vector<1xf32> to vector<1x1x1xf32>
    %20 = vector.extract %19[0, 0, 0] : f32 from vector<1x1x1xf32>
    %21 = vector.broadcast %20 : f32 to vector<1x1xf32>
    %22 = arith.addf %15, %21 : vector<1x1xf32>
    %c0_11 = arith.constant 0 : index
    %c0_12 = arith.constant 0 : index
    %23 = vector.load %arg5[%c0_11, %c0_12] : memref<1x1xf32, #tpu.memory_space<vmem>>, vector<1x1xf32>
    tpu.vector_store %arg5[%c0_11, %c0_12], %22 {strides = array<i32>} : memref<1x1xf32, #tpu.memory_space<vmem>>, vector<1x1xf32>,
    %c3_i32 = arith.constant 3 : i32
    %24 = arith.cmpi eq, %arg0, %c3_i32 : i32
    %25 = arith.extui %24 : i1 to i32
    %c0_i32_13 = arith.constant 0 : i32
    %26 = arith.cmpi ne, %25, %c0_i32_13 : i32
    scf.if %26 {
      %c0_14 = arith.constant 0 : index
      %c0_15 = arith.constant 0 : index
      %27 = vector.load %arg4[%c0_14, %c0_15] : memref<1x1xf32, #tpu.memory_space<vmem>>, vector<1x1xf32>
      %c0_16 = arith.constant 0 : index
      %c0_17 = arith.constant 0 : index
      %28 = vector.load %arg5[%c0_16, %c0_17] : memref<1x1xf32, #tpu.memory_space<vmem>>, vector<1x1xf32>
      %29 = arith.mulf %27, %27 : vector<1x1xf32>
      %cst_18 = arith.constant 6.553600e+04 : f32
      %30 = vector.broadcast %cst_18 : f32 to vector<1x1xf32>
      %31 = arith.divf %29, %30 : vector<1x1xf32>
      %32 = arith.subf %28, %31 : vector<1x1xf32>
      %cst_19 = arith.constant 6.553500e+04 : f32
      %33 = vector.broadcast %cst_19 : f32 to vector<1x1xf32>
      %34 = arith.divf %32, %33 : vector<1x1xf32>
      %c0_20 = arith.constant 0 : index
      %c0_21 = arith.constant 0 : index
      %35 = vector.load %arg3[%c0_20, %c0_21] : memref<1x1xf32, #tpu.memory_space<vmem>>, vector<1x1xf32>
      tpu.vector_store %arg3[%c0_20, %c0_21], %34 {strides = array<i32>} : memref<1x1xf32, #tpu.memory_space<vmem>>, vector<1x1xf32>,
    } else {
    }
    return
  }
  func.func @transform_0(%arg0: i32) -> (i32, i32) {
    %c0_i32 = arith.constant 0 : i32
    %c0_i32_0 = arith.constant 0 : i32
    %c0_i32_1 = arith.constant 0 : i32
    return %c0_i32, %c0_i32_0 : i32, i32
  }
  func.func @transform_1(%arg0: i32) -> (i32, i32) {
    %c0_i32 = arith.constant 0 : i32
    %c0_i32_0 = arith.constant 0 : i32
    return %arg0, %c0_i32 : i32, i32
  }
  func.func @transform_2(%arg0: i32) -> (i32, i32) {
    %c0_i32 = arith.constant 0 : i32
    %c0_i32_0 = arith.constant 0 : i32
    %c0_i32_1 = arith.constant 0 : i32
    return %c0_i32, %c0_i32_0 : i32, i32
  }
}

</mosaic_0001>

<bundles_post_ra>
// kernel: tpu_custom_call.1
= control target key start
LH: loop header
LB: loop body
LE: loop exit
PB: predicated region body
PF: predicated region fallthrough
CT: control target
= control target key end

     0   :  { %s693_s0 = inlined_call_operand.<no memory space> [shape: f32[1,1], index: 0, kind: input, shape index: {}]   ;;  %s694_s1 = inlined_call_operand.hbm [shape: f32[256,256], index: 1, kind: input, shape index: {}]   ;;  %s695_s2 = inlined_call_operand.hbm [shape: f32[1,1], index: 2, kind: output, shape index: {}]  }
   0x1   :  { %7 = sst [smem:[#allocation4]] %s693_s0 }
   0x2   :  { %8 = vsyncpa [#allocation6], 0 }
   0x3   :  { %10 = vsyncpa [#allocation6 + $0x1], 0 }
   0x4   :  { %11 = vsyncpa [#allocation7], 0  ;;  %s526_s11 = smov 0   ;;  %s528_s12 = smov 0  }
   0x5   :  { %s530_s13 = smov 0   ;;  %s532_s14 = smov 0  }
   0x6 LB: > { %s545_s0 = sadd.s32 4294967295, %s501_s14   ;;  %s548_s15 = sadd.s32 1, %s501_s14   ;;  %s501_s14 = sphi %s532_s14, %s702_s14   ;;  %s497_s13 = sphi %s530_s13, %s701_s13   ;;  %s493_s12 = sphi %s528_s12, %s700_s12   ;;  %s489_s11 = sphi %s526_s11, %s699_s11  }
   0x7   : > { %s42_s16 = ssub.s32 %s501_s14, %s548_s15  ;;  %s45_s17 = sadd.s32 1, %s497_s13 }
   0x8   : > { %p43_p0 = scmp.eq.s32.totalorder %s42_s16, 0  ;;  %p52_p1 = scmp.ne.s32.totalorder %s497_s13, %s493_s12 }
   0x9   : > { %p53_p2 = scmp.eq.s32.totalorder %s501_s14, 0  ;;  %p58_p3 = scmp.ne.s32.totalorder %s493_s12, %s489_s11 }
   0xa   : > { %s558_s18 = scalar_select %p43_p0, %s497_s13, %s45_s17  }
   0xb   : > { %p54_p4 = por %p53_p2, %p52_p1  ;;  %p59_p5 = scmp.eq.s32.totalorder %s545_s0, 0 }
   0xc   : > { %p368_p6 = scmp.lt.s32.totalorder %s501_s14, 4  ;;  %s106_s20 = sand.u32 1, %s497_s13  }
   0xd   : > { %p562_p7 = por %p59_p5, %p58_p3  ;;  %s340_s21 = sshll.u32 %s106_s20, 7 }
   0xe   : > { %s353_s22 = sshll.u32 %s501_s14, 11  ;;  %s110_s26 = scalar_lea.vmem [#allocation5], %s340_s21 }
   0xf   : > { %s571_s25 = scalar_lea.hbm %s694_s1, %s353_s22  ;;  %s118_s27 = sshll.u32 %s110_s26, 4  ;;  %s573_s27 = int_to_ptr.vmem [resolvable:$true] %s118_s27 }
  0x10   : > { %p575_p8 = pnand %p368_p6, %p54_p4  ;;  %s580_s29 = scalar_lea.sflag [#allocation6], %s106_s20 }
  0x11   : > { %s407_s30 = scalar_lea.hbm %s571_s25, 2048  ;;  %s412_s5 = scalar_lea.hbm %s694_s1, 8192 }
  0x12   : > { %p408_p10 = scmp.ne.s32.totalorder %s571_s25, %s407_s30  ;;  %p409_p11 = pneg %p575_p8 }
  0x13   : > { %p413_p0 = scmp.lt.u32.totalorder %s571_s25, %s694_s1  ;;  %p414_p1 = scmp.lt.u32.totalorder %s412_s5, %s407_s30 }
  0x14   : > { %p410_p12 = pnand %p409_p11, %p408_p10  ;;  %p416_p3 = scmp.lt.u32.totalorder %s407_s30, %s571_s25 }
  0x15   : > { %p415_p2 = por %p414_p1, %p413_p0 }
  0x16   : > { %p411_p13 = pneg %p410_p12 }
  0x17   : > { %p417_p4 = por %p416_p3, %p415_p2 }
  0x19   : > { %p418_p5 = pnand %p417_p4, %p411_p13 }
  0x1b   : > { %421 = shalt.err (!%p418_p5)
}
  0x1c   : > { %s422_s8 = scalar_lea.vmem %s573_s27, 2048  ;;  %s503_s9 = smov [#allocation5]  }
  0x1d   : > { %p423_p6 = scmp.ne.s32.totalorder %s573_s27, %s422_s8  ;;  %s427_s10 = sshll.u32 %s503_s9, 4  ;;  %s428_s10 = int_to_ptr.vmem [resolvable:$false] %s427_s10 }
  0x1e   : > { %s429_s11 = scalar_lea.vmem %s428_s10, 4096  ;;  %p430_p9 = scmp.lt.s32.totalorder %s573_s27, %s428_s10 }
  0x1f   : > { %p425_p10 = pnand %p423_p6, %p409_p11  ;;  %p431_p0 = scmp.lt.s32.totalorder %s429_s11, %s422_s8 }
  0x21   : > { %p426_p12 = pneg %p425_p10  ;;  %p432_p1 = por %p431_p0, %p430_p9 }
  0x23   : > { %p433_p2 = pnand %p432_p1, %p426_p12 }
  0x25   : > { %436 = shalt.err (!%p433_p2)
}
  0x26   : > { %s504_s16 = smov 256   ;;  %s505_s17 = smov 16  }
  0x27   : > { %367 = dma.hbm_to_vmem [thread:$0]  (!%p575_p8), %s571_s25, 2048, %s573_s27, %s580_s29, %s504_s16, %s504_s16, %s505_s17  }
  0x28   : > { %p126_p11 = scmp.lt.s32.totalorder %s501_s14, 5  ;;  %p698_p13 = scmp.ge.s32.totalorder %s501_s14, 1 }
  0x2a   : > { %p127_p3 = pnand %p698_p13, %p126_p11 }
  0x2b   : > { %s132_s20 = sand.u32 (!%p127_p3), 1, %s493_s12  }
  0x2c   : > { %130 = sbr.rel (%p127_p3) target bundleno = 349 (0x15d), region = 28  ;;  %s345_s21 = sshll.u32 (!%p127_p3), %s132_s20, 7 }
  0x2d   : > { %s133_s22 = scalar_lea.sflag (!%p127_p3), [#allocation6], %s132_s20  ;;  %s612_s23 = scalar_lea.vmem (!%p127_p3), [#allocation5], %s345_s21 }
  0x33   : > { %480 = dma.done.wait (%p562_p7), %s133_s22, 2048  }
  0x34   : > { %482 = vsyncadd (%p562_p7), %s133_s22, 4294965248  ;;  %p346_p9 = scmp.ne.s32.totalorder %s545_s0, 0 }
  0x35   : > { %vm157_vm0 = vcmask (!%p346_p9), 0   ;;  %v506_v0 = vmov (!%p346_p9), 0.0  }
  0x36   : > { %156 = sbr.rel (%p346_p9) target bundleno = 61 (0x3d), region = 36  ;;  %158 = vst.msk [vmem:[#allocation2] sm:$0x1] (!%p346_p9), %vm157_vm0, %v506_v0  ;;  %159 = vst.msk [vmem:[#allocation3] sm:$0x1] (!%p346_p9), %vm157_vm0, %v506_v0 }
  0x3d PF: > { %s176_s14 = sld [smem:[#allocation4]]  ;;  %v160_v1 = vld [vmem:[%s612_s23] sm:$0xff]  ;;  %v161_v2 = vld [vmem:[%s612_s23 + $0x8] sm:$0xff]  ;;  %v162_v3 = vld [vmem:[%s612_s23 + $0x10] sm:$0xff]  ;;  %vm221_vm1 = vcmask 0   ;;  %p347_p7 = scmp.ne.s32.totalorder %s545_s0, 3 }
  0x3e   : > { %v163_v7 = vld [vmem:[%s612_s23 + $0x18] sm:$0xff]  ;;  %v164_v9 = vld [vmem:[%s612_s23 + $0x20] sm:$0xff]  ;;  %v165_v14 = vld [vmem:[%s612_s23 + $0x28] sm:$0xff] }
  0x3f   : > { %v166_v18 = vld [vmem:[%s612_s23 + $0x30] sm:$0xff]  ;;  %v167_v23 = vld [vmem:[%s612_s23 + $0x38] sm:$0xff]  ;;  %v168_v28 = vld [vmem:[%s612_s23 + $0x40] sm:$0xff] }
  0x40   : > { %v169_v33 = vld [vmem:[%s612_s23 + $0x48] sm:$0xff]  ;;  %v170_v38 = vld [vmem:[%s612_s23 + $0x50] sm:$0xff]  ;;  %v171_v43 = vld [vmem:[%s612_s23 + $0x58] sm:$0xff] }
  0x41   : > { %v172_v48 = vld [vmem:[%s612_s23 + $0x60] sm:$0xff]  ;;  %v173_v53 = vld [vmem:[%s612_s23 + $0x68] sm:$0xff]  ;;  %v174_v58 = vld [vmem:[%s612_s23 + $0x70] sm:$0xff] }
  0x42   : > { %v175_v63 = vld [vmem:[%s612_s23 + $0x78] sm:$0xff] }
  0x43   : > { %v622_v4 = vstv %s176_s14 }
  0x44   : > { %v178_v5 = vsub.f32 %v160_v1, %v622_v4  ;;  %v179_v6 = vsub.f32 %v161_v2, %v622_v4  ;;  %v180_v8 = vsub.f32 %v162_v3, %v622_v4  ;;  %v181_v10 = vsub.f32 %v163_v7, %v622_v4 }
  0x45   : > { %v182_v15 = vsub.f32 %v164_v9, %v622_v4  ;;  %v183_v19 = vsub.f32 %v165_v14, %v622_v4  ;;  %v184_v24 = vsub.f32 %v166_v18, %v622_v4  ;;  %v185_v29 = vsub.f32 %v167_v23, %v622_v4 }
  0x46   : > { %v195_v11 = vadd.f32 %v179_v6, %v178_v5  ;;  %v224_v12 = vmul.f32 %v178_v5, %v178_v5  ;;  %v225_v13 = vmul.f32 %v179_v6, %v179_v6  ;;  %v226_v17 = vmul.f32 %v180_v8, %v180_v8 }
  0x47   : > { %v227_v21 = vmul.f32 %v181_v10, %v181_v10  ;;  %v228_v26 = vmul.f32 %v182_v15, %v182_v15  ;;  %v229_v31 = vmul.f32 %v183_v19, %v183_v19  ;;  %v186_v34 = vsub.f32 %v168_v28, %v622_v4 }
  0x48   : > { %v196_v16 = vadd.f32 %v195_v11, %v180_v8  ;;  %v240_v22 = vadd.f32 %v225_v13, %v224_v12  ;;  %v230_v36 = vmul.f32 %v184_v24, %v184_v24  ;;  %v187_v39 = vsub.f32 %v169_v33, %v622_v4  ;;  %v223_v33 = vld [vmem:[#allocation3] sm:$0x1] }
  0x49   : > { %v231_v41 = vmul.f32 %v185_v29, %v185_v29  ;;  %v188_v44 = vsub.f32 %v170_v38, %v622_v4  ;;  %v232_v46 = vmul.f32 %v186_v34, %v186_v34  ;;  %v189_v49 = vsub.f32 %v171_v43, %v622_v4 }
  0x4a   : > { %v197_v20 = vadd.f32 %v196_v16, %v181_v10  ;;  %v241_v27 = vadd.f32 %v240_v22, %v226_v17  ;;  %v233_v51 = vmul.f32 %v187_v39, %v187_v39  ;;  %v190_v54 = vsub.f32 %v172_v48, %v622_v4 }
  0x4b   : > { %v234_v56 = vmul.f32 %v188_v44, %v188_v44  ;;  %v191_v59 = vsub.f32 %v173_v53, %v622_v4  ;;  %v235_v61 = vmul.f32 %v189_v49, %v189_v49  ;;  %v192_v0 = vsub.f32 %v174_v58, %v622_v4 }
  0x4c   : > { %v198_v25 = vadd.f32 %v197_v20, %v182_v15  ;;  %v242_v32 = vadd.f32 %v241_v27, %v227_v21  ;;  %v236_v2 = vmul.f32 %v190_v54, %v190_v54  ;;  %v193_v5 = vsub.f32 %v175_v63, %v622_v4 }
  0x4d   : > { %v237_v7 = vmul.f32 %v191_v59, %v191_v59  ;;  %v238_v10 = vmul.f32 %v192_v0, %v192_v0 }
  0x4e   : > { %v199_v30 = vadd.f32 %v198_v25, %v183_v19  ;;  %v243_v37 = vadd.f32 %v242_v32, %v228_v26  ;;  %v239_v13 = vmul.f32 %v193_v5, %v193_v5 }
  0x50   : > { %v200_v35 = vadd.f32 %v199_v30, %v184_v24  ;;  %v244_v42 = vadd.f32 %v243_v37, %v229_v31  ;;  %v194_v30 = vld [vmem:[#allocation2] sm:$0x1] }
  0x52   : > { %v201_v40 = vadd.f32 %v200_v35, %v185_v29  ;;  %v245_v47 = vadd.f32 %v244_v42, %v230_v36 }
  0x54   : > { %v202_v45 = vadd.f32 %v201_v40, %v186_v34  ;;  %v246_v52 = vadd.f32 %v245_v47, %v231_v41 }
  0x56   : > { %v203_v50 = vadd.f32 %v202_v45, %v187_v39  ;;  %v247_v57 = vadd.f32 %v246_v52, %v232_v46 }
  0x58   : > { %v204_v55 = vadd.f32 %v203_v50, %v188_v44  ;;  %v248_v62 = vadd.f32 %v247_v57, %v233_v51 }
  0x5a   : > { %v205_v60 = vadd.f32 %v204_v55, %v189_v49  ;;  %v249_v3 = vadd.f32 %v248_v62, %v234_v56 }
  0x5c   : > { %v206_v1 = vadd.f32 %v205_v60, %v190_v54  ;;  %v250_v8 = vadd.f32 %v249_v3, %v235_v61 }
  0x5e   : > { %v207_v6 = vadd.f32 %v206_v1, %v191_v59  ;;  %v251_v11 = vadd.f32 %v250_v8, %v236_v2 }
  0x60   : > { %v208_v9 = vadd.f32 %v207_v6, %v192_v0  ;;  %v252_v14 = vadd.f32 %v251_v11, %v237_v7 }
  0x62   : > { %v209_v12 = vadd.f32 %v208_v9, %v193_v5  ;;  %v253_v15 = vadd.f32 %v252_v14, %v238_v10 }
  0x64   : > { %210 = vadd.xlane.f32.xlu0 %v209_v12  ;;  %v254_v16 = vadd.f32 %v253_v15, %v239_v13 }
  0x68   : > { %255 = vadd.xlane.f32.xlu0 %v254_v16 }
  0xf1   : > { %v211_v17 = vpop.xlane.xlu0 %210 }
  0xf2   : > { %v212_v18 = vrot.slane %v211_v17, 4 }
  0xf4   : > { %v213_v19 = vadd.f32 %v212_v18, %v211_v17 }
  0xf5   : > { %v256_v20 = vpop.xlane.xlu0 %255 }
  0xf6   : > { %v214_v21 = vrot.slane %v213_v19, 2  ;;  %v257_v22 = vrot.slane %v256_v20, 4 }
  0xf8   : > { %v258_v4 = vadd.f32 %v257_v22, %v256_v20  ;;  %v215_v23 = vadd.f32 %v214_v21, %v213_v19 }
  0xfa   : > { %v259_v24 = vrot.slane %v258_v4, 2  ;;  %v216_v25 = vrot.slane %v215_v23, 1 }
  0xfc   : > { %v260_v26 = vadd.f32 %v259_v24, %v258_v4  ;;  %v217_v27 = vadd.f32 %v216_v25, %v215_v23 }
  0xfe   : > { %354 = vpush %v217_v27  ;;  %v261_v28 = vrot.slane %v260_v26, 1 }
 0x100   : > { %v262_v29 = vadd.f32 %v261_v28, %v260_v26 }
 0x102   : > { %356 = vpush %v262_v29 }
 0x12f   : > { %s355_s19 = spop %354 }
 0x130   : > { %v219_v31 = vstv %s355_s19 }
 0x131   : > { %v220_v32 = vadd.f32 %v219_v31, %v194_v30  ;;  %270 = sbr.rel (%p347_p7) target bundleno = 324 (0x144), region = 40 }
 0x133   : > { %222 = vst.msk [vmem:[#allocation2] sm:$0x1] %vm221_vm1, %v220_v32  ;;  %s357_s24 = spop %356 }
 0x134   : > { %v264_v34 = vstv %s357_s24 }
 0x135   : > { %v265_v35 = vadd.f32 %v264_v34, %v223_v33 }
 0x137   : > { %266 = vst.msk [vmem:[#allocation3] sm:$0x1] %vm221_vm1, %v265_v35 }
 0x13a   : > { %v271_v36 = vld [vmem:[#allocation2] sm:$0x1] }
 0x13b   : > { %v273_v37 = vmul.f32 %v271_v36, %v271_v36 }
 0x13d   : > { %v275_v39 = vmul.f32 1.5258789e-05, %v273_v37 }
 0x13e   : > { %v272_v38 = vld [vmem:[#allocation3] sm:$0x1] }
 0x13f   : > { %v276_v40 = vsub.f32 %v272_v38, %v275_v39 }
 0x141   : > { %v278_v41 = vmul.f32 1.5259022e-05, %v276_v40 }
 0x143   : > { %279 = vst.msk [vmem:[#allocation8] sm:$0x1] %vm221_vm1, %v278_v41 }
 0x144 PF: > { %p369_p8 = scmp.eq.s32.totalorder %s545_s0, 3  ;;  %s507_s25 = smov [#allocation8]  }
 0x145   : > { %s287_s26 = sshll.u32 %s507_s25, 4  ;;  %s288_s26 = int_to_ptr.vmem [resolvable:$true] %s287_s26 }
 0x146   : > { %s437_s27 = scalar_lea.vmem %s288_s26, 16  ;;  %s443_s28 = scalar_lea.vmem %s288_s26, 32 }
 0x147   : > { %p438_p4 = scmp.ne.s32.totalorder %s288_s26, %s437_s27  ;;  %p444_p10 = scmp.lt.s32.totalorder %s288_s26, %s288_s26 }
 0x148   : > { %p445_p12 = scmp.lt.s32.totalorder %s443_s28, %s437_s27 }
 0x149   : > { %p439_p5 = pnand %p438_p4, %p369_p8 }
 0x14a   : > { %p446_p0 = por %p445_p12, %p444_p10 }
 0x14b   : > { %p440_p6 = pneg %p439_p5 }
 0x14d   : > { %p447_p1 = pnand %p446_p0, %p440_p6 }
 0x14f   : > { %450 = shalt.err (!%p447_p1)
}
 0x150   : > { %s451_s3 = scalar_lea.hbm %s695_s2, 16 }
 0x151   : > { %p452_p2 = scmp.ne.s32.totalorder %s695_s2, %s451_s3  ;;  %p457_p3 = scmp.lt.u32.totalorder %s451_s3, %s695_s2 }
 0x153   : > { %p453_p11 = pnand %p452_p2, %p369_p8 }
 0x155   : > { %p454_p13 = pneg %p453_p11 }
 0x157   : > { %p459_p9 = pnand %p457_p3, %p454_p13 }
 0x159   : > { %462 = shalt.err (!%p459_p9)
}
 0x15a   : > { %361 = dma.vmem_to_hbm [thread:$0]  (%p369_p8), %s288_s26, 16, %s695_s2, [#allocation7]  }
 0x15b   : > { %484 = dma.done.wait (%p369_p8), [#allocation7], 16  }
 0x15c   : > { %486 = vsyncadd (%p369_p8), [#allocation7], 4294967280 }
 0x15d PF: > { %p14_p7 = scmp.ge.s32.totalorder %s548_s15, 6   ;;  %s699_s11 = smov %s493_s12 }
 0x15e   : > { %s700_s12 = smov %s497_s13  ;;  %s701_s13 = smov %s558_s18 }
 0x15f   : > { %s702_s14 = smov %s548_s15  ;;  %16 = sbr.rel (!%p14_p7) target bundleno = 6 (0x6), region = 73 }
 0x166   :  { %300 = vsyncpa [#allocation6], 1 }
 0x167   :  { %302 = vsyncpa [#allocation6 + $0x1], 1 }
 0x168   :  { %303 = vsyncpa [#allocation7], 1 }
 0x169   :  { %305 = vsyncpa [#allocation7 + $0x1], 1 }

</bundles_post_ra>
